<compile_context>
chip_gen: v6e
topology: v6e:2x2x1
jax: 0.10.0
libtpu: 0.0.40
codegen_flags: <defaults>
</compile_context>

<pallas_src>
import math

import jax
import jax.numpy as jnp
from jax.experimental import pallas as pl
from jax.experimental.pallas import tpu as pltpu


def _make_kernel(num_heads, head_dim, tb, L, mxu_dtype, lane_dense_out):
    d = num_heads * head_dim
    rows = tb * L

    def kernel(z_ref, wqkv_ref, bqkv_ref, wproj_ref, bproj_ref, mask_ref, o_ref):
        # (tb, L, d) -> (rows, d): leading-dim merge only, no lane relayout.
        z2 = z_ref[...].reshape(rows, d).astype(mxu_dtype)

        # Fused qkv projection in the transposed domain: qkv^T = W_attn @ z^T.
        # W_attn stays in native torch (3d, d) layout (scale pre-folded into the
        # Q rows on the host); contracting both operands on their minor dim
        # avoids an in-kernel transpose of z and yields a lane-dense result.
        qkv_t = jax.lax.dot_general(
            wqkv_ref[...], z2, (((1,), (1,)), ((), ())),
            preferred_element_type=jnp.float32)                      # (3d, rows)
        # Bias add (lane broadcast), then ONE cast to the MXU operand dtype.
        qkv_t = (qkv_t + bqkv_ref[...]).astype(mxu_dtype)

        # Heads ride the sublane axis, so per-head q/k/v are free sublane-tile
        # slices and every MXU push is `rows` wide.  The (rows x rows) scores use
        # the precomputed block-diagonal additive mask (0 / -1e30) so that
        # queries only attend to keys of the same folded batch element.
        mask = mask_ref[...]
        y_t = []
        for h in range(num_heads):
            lo = h * head_dim
            q_t = qkv_t[lo:lo + head_dim, :]                         # (hd, rows)
            k_t = qkv_t[d + lo:d + lo + head_dim, :]                 # (hd, rows)
            v_t = qkv_t[2 * d + lo:2 * d + lo + head_dim, :]         # (hd, rows)

            # Scores: (rows, hd) @ (hd, rows); 1/sqrt(hd) already folded into W_q.
            s = jnp.dot(q_t.T, k_t, preferred_element_type=jnp.float32) + mask
            m = jnp.max(s, axis=-1, keepdims=True)
            p = jnp.exp(s - m)
            p = p * pl.reciprocal(jnp.sum(p, axis=-1, keepdims=True), approx=True)

            # y_h^T = V_h^T @ P_h^T (contract both operands on the key axis).
            y_t.append(jax.lax.dot_general(
                v_t, p.astype(mxu_dtype), (((1,), (1,)), ((), ())),
                preferred_element_type=jnp.float32))                 # (hd, rows)

        # Merge heads along sublanes (cheap) and run c_proj as ONE K=d matmul:
        # out^T = W_proj @ y^T  (+ bias via lane broadcast).
        y_all_t = jnp.concatenate(y_t, axis=0).astype(mxu_dtype)     # (d, rows)
        out_t = jnp.dot(wproj_ref[...], y_all_t,
                        preferred_element_type=jnp.float32) + bproj_ref[...]
        out = out_t.T                                                # (rows, d)

        # TODO(synk): attn_dropout / resid_dropout are identity in eval mode; not lowered.
        if lane_dense_out:
            # Lane-dense store: one relayout to (tb, L*d)-wide rows so writeback
            # uses full-width vst instead of d(=32)-lane masked stores.
            o_ref[...] = out.reshape(tb, L * d).astype(o_ref.dtype)
        else:
            o_ref[...] = out.reshape(tb, L, d).astype(o_ref.dtype)

    return kernel


def _vmem_capacity_bytes():
    try:
        cap = getattr(pltpu.get_tpu_info(), "vmem_capacity_bytes", None)
        if cap:
            return int(cap)
    except Exception:
        pass
    return 64 * 2 ** 20  # conservative default (v7x has 64 MiB per TensorCore)


def _step_vmem_bytes(tb, L, d, x_item, w_item):
    """Per-grid-step VMEM estimate, including the temporaries the previous
    estimate omitted (qkv^T + its MXU-dtype copy, per-head score matrices, the
    block-diagonal mask, merged y^T, out) plus headroom for unrolled-loop overlap."""
    r = tb * L
    io = 2 * r * d * x_item + 2 * r * d * 4                  # z + out blocks, double-buffered
    wts = 2 * ((3 * d * d + d * d) * w_item + (4 * d) * 4)   # weights + biases, 2 pipeline bufs
    wts += 2 * r * r * 4                                     # block-diagonal mask, 2 bufs
    tmp = (3 * d * r * (4 + x_item)                          # qkv^T f32 + MXU-dtype copy
           + r * r * (8 + x_item)                            # scores f32 + exp temps + p cast
           + d * r * (4 + x_item)                            # merged y^T + out^T
           + r * d * 4)                                      # out / relayout slack
    return io + wts + int(1.25 * tmp)


def _choose_batch_tile(B, L, d, x_item, w_item, vmem_budget_bytes, row_target=128):
    """Fold batch elements per grid step.  Target ~128 matmul rows (fills the MXU
    M dim on v5e and keeps the block-diagonal softmax's O(rows^2) exp work and
    vreg pressure bounded) subject to the per-generation VMEM budget."""
    tb = max(1, min(B, pl.cdiv(row_target, L)))
    while tb > 1 and _step_vmem_bytes(tb, L, d, x_item, w_item) > vmem_budget_bytes:
        tb -= 1
    # v7x has two TensorCores: prefer >=2 grid steps when each step still keeps
    # >=64 matmul rows (harmless on single-TC v5e/v6e).
    if B // tb < 2 and (tb // 2) * L >= 64:
        tb //= 2
    # Multi-step grids with the lane-dense 2-D output need a sublane-aligned tile.
    if tb < B and tb > 8 and tb % 8 != 0:
        tb = (tb // 8) * 8
    return tb


def _pallas_forward(zp, w_attn2, b_attn2, w_proj2, b_proj2, attn_mask, *,
                    num_heads, head_dim, tb, mxu_dtype, lane_dense_out,
                    vmem_limit_bytes, cost, out_dtype):
    Bp, L, d = zp.shape
    R = tb * L
    kernel = _make_kernel(num_heads, head_dim, tb, L, mxu_dtype, lane_dense_out)
    if lane_dense_out:
        out_shape = jax.ShapeDtypeStruct((Bp, L * d), out_dtype)
        out_spec = pl.BlockSpec((tb, L * d), lambda i: (i, 0))
    else:
        out_shape = jax.ShapeDtypeStruct((Bp, L, d), out_dtype)
        out_spec = pl.BlockSpec((tb, L, d), lambda i: (i, 0, 0))
    return pl.pallas_call(
        kernel,
        out_shape=out_shape,
        grid_spec=pltpu.PrefetchScalarGridSpec(
            num_scalar_prefetch=0,
            grid=(Bp // tb,),
            in_specs=[
                pl.BlockSpec((tb, L, d), lambda i: (i, 0, 0)),   # z (batch tile)
                # Grid-invariant operands (constant index_map -> fetched once).
                pl.BlockSpec((3 * d, d), lambda i: (0, 0)),      # c_attn.weight (torch layout, Q rows pre-scaled)
                pl.BlockSpec((3 * d, 1), lambda i: (0, 0)),      # c_attn.bias (column)
                pl.BlockSpec((d, d), lambda i: (0, 0)),          # c_proj.weight (torch layout)
                pl.BlockSpec((d, 1), lambda i: (0, 0)),          # c_proj.bias (column)
                pl.BlockSpec((R, R), lambda i: (0, 0)),          # block-diagonal additive mask
            ],
            out_specs=out_spec,
        ),
        compiler_params=pltpu.CompilerParams(
            dimension_semantics=("parallel",),   # megacore / dual-TC batch-tile sharding
            vmem_limit_bytes=vmem_limit_bytes,
        ),
        cost_estimate=cost,
    )(zp, w_attn2, b_attn2, w_proj2, b_proj2, attn_mask)


_LANE_DENSE_OK = {}  # memoized: can this Mosaic build lower the (rows,d)->(tb,L*d) relayout?


def latent_attention_rl(z, w_attn, b_attn, w_proj, b_proj, *, num_heads,
                        mxu_dtype=jnp.float32, batch_tile=None):
    """z: (B, L, d).  Weights in PyTorch nn.Linear layout: w_attn (3d, d),
    b_attn (3d,), w_proj (d, d), b_proj (d,).  Returns (B, L, d).
    bf16 MXU operands are recommended on v5e/v6e/v7x (the MXU is bf16-native on
    all three); softmax / bias / accumulation math stays f32 either way."""
    B, L, d = z.shape
    assert d % num_heads == 0
    head_dim = d // num_heads
    assert w_attn.shape == (3 * d, d) and w_proj.shape == (d, d)

    # One-time host-side prep: keep torch layouts (used in the transposed domain),
    # fold 1/sqrt(head_dim) into the Q rows of c_attn, make biases columns.
    scale = 1.0 / math.sqrt(head_dim)
    w_attn2 = jnp.asarray(w_attn, jnp.float32).at[:d].multiply(scale).astype(mxu_dtype)
    b_attn2 = jnp.asarray(b_attn, jnp.float32).at[:d].multiply(scale).reshape(3 * d, 1)
    w_proj2 = jnp.asarray(w_proj, dtype=mxu_dtype)
    b_proj2 = jnp.asarray(b_proj, jnp.float32).reshape(d, 1)

    x_item = 2 if mxu_dtype == jnp.bfloat16 else 4
    cap = _vmem_capacity_bytes()
    # Generation-aware budget: ~24 MiB on v7x (64 MiB VMEM), ~56 MiB on v5e/v6e (128 MiB).
    budget = max(16 * 2 ** 20, cap // 2 - 8 * 2 ** 20)
    tb = batch_tile if batch_tile is not None else _choose_batch_tile(
        B, L, d, x_item, x_item, budget)

    pad = (-B) % tb
    zp = jnp.pad(z, ((0, pad), (0, 0), (0, 0))) if pad else z
    zp = zp.astype(mxu_dtype)            # bf16 mode also halves z's HBM->VMEM DMA
    Bp = B + pad
    R = tb * L

    # Block-diagonal additive mask (0 / -1e30): row r belongs to folded batch
    # element r // L and may only attend to keys of the same element.
    bid = jnp.arange(R, dtype=jnp.int32) // L
    attn_mask = jnp.where(bid[:, None] == bid[None, :], 0.0, -1e30).astype(jnp.float32)

    est = _step_vmem_bytes(tb, L, d, x_item, x_item)
    vmem_limit = int(min(cap - 8 * 2 ** 20,
                         max(32 * 2 ** 20, budget + 16 * 2 ** 20, est + 8 * 2 ** 20)))

    H = num_heads
    steps = Bp // tb
    flops = int(steps * (2 * 3 * d * d * R            # qkv projection
                         + H * 4 * R * R * head_dim   # block-diagonal scores + attn*V
                         + 2 * d * d * R))            # output projection
    bytes_accessed = int(zp.size * zp.dtype.itemsize + Bp * L * d * 4
                         + (w_attn2.size + w_proj2.size) * x_item
                         + (b_attn2.size + b_proj2.size + attn_mask.size) * 4)
    cost = pl.CostEstimate(flops=flops, transcendentals=int(steps * H * R * R),
                           bytes_accessed=bytes_accessed)

    kwargs = dict(num_heads=num_heads, head_dim=head_dim, tb=tb, mxu_dtype=mxu_dtype,
                  vmem_limit_bytes=vmem_limit, cost=cost, out_dtype=z.dtype)

    lane_dense_legal = (tb == Bp) or (tb % 8 == 0)
    if lane_dense_legal and _LANE_DENSE_OK.get("ok", True):
        try:
            out2d = _pallas_forward(zp, w_attn2, b_attn2, w_proj2, b_proj2, attn_mask,
                                    lane_dense_out=True, **kwargs)
            out2d = jax.block_until_ready(out2d)   # force compile here so a lowering
            _LANE_DENSE_OK["ok"] = True            # failure is caught right here
            return out2d[:B].reshape(B, L, d)      # layout-preserving reshape (free)
        except Exception:
            # This Mosaic build cannot lower the (rows, d) -> (tb, L*d) relayout;
            # fall back to the 3-D (masked-store) output layout.
            _LANE_DENSE_OK["ok"] = False
    out3d = _pallas_forward(zp, w_attn2, b_attn2, w_proj2, b_proj2, attn_mask,
                            lane_dense_out=False, **kwargs)
    return out3d[:B]


def _reference(z, w_attn, b_attn, w_proj, b_proj, num_heads):
    """Pure-JAX reference mirroring the PyTorch forward (eval mode)."""
    B, L, d = z.shape
    hd = d // num_heads
    qkv = jnp.einsum("bld,od->blo", z, w_attn) + b_attn
    q, k, v = jnp.split(qkv, 3, axis=-1)

    def to_heads(x):
        return x.reshape(B, L, num_heads, hd).transpose(0, 2, 1, 3)  # (B, H, L, hd)

    q, k, v = to_heads(q), to_heads(k), to_heads(v)
    s = jnp.einsum("bhld,bhmd->bhlm", q, k) / math.sqrt(hd)
    p = jax.nn.softmax(s, axis=-1)
    y = jnp.einsum("bhlm,bhmd->bhld", p, v)
    y = y.transpose(0, 2, 1, 3).reshape(B, L, d)
    return jnp.einsum("bld,od->blo", y, w_proj) + b_proj


if __name__ == "__main__":
    # Module hyper-params (small, consistent with the forward pass)
    B, L_new, d_new = 2, 8, 32
    num_heads_latent = 4
    # dropout = 0.0 (eval mode), bias = True

    key = jax.random.PRNGKey(0)
    kz, k1, k2, k3, k4 = jax.random.split(key, 5)
    bound = 1.0 / math.sqrt(d_new)
    w_attn = jax.random.uniform(k1, (3 * d_new, d_new), jnp.float32, -bound, bound)
    b_attn = jax.random.uniform(k2, (3 * d_new,), jnp.float32, -bound, bound)
    w_proj = jax.random.uniform(k3, (d_new, d_new), jnp.float32, -bound, bound)
    b_proj = jax.random.uniform(k4, (d_new,), jnp.float32, -bound, bound)
    z = jax.random.normal(kz, (B, L_new, d_new), jnp.float32)

    ref = _reference(z, w_attn, b_attn, w_proj, b_proj, num_heads_latent)

    # f32 MXU operands.
    out = latent_attention_rl(z, w_attn, b_attn, w_proj, b_proj,
                              num_heads=num_heads_latent)
    out = jax.block_until_ready(out)
    assert out.shape == (B, L_new, d_new)
    # Tolerance bounds the EUP approx-reciprocal (~2^-12) plus default-precision
    # MXU rounding of the f32 matmuls.
    assert jnp.allclose(out, ref, atol=5e-3, rtol=5e-3), "f32 kernel mismatch vs reference"

    # bf16 MXU operands (recommended on v5e/v6e/v7x); weights are quantized to
    # bf16 on the host, so the comparison vs. the f32-weight reference is looser.
    out_bf16 = latent_attention_rl(z, w_attn, b_attn, w_proj, b_proj,
                                   num_heads=num_heads_latent,
                                   mxu_dtype=jnp.bfloat16)
    out_bf16 = jax.block_until_ready(out_bf16)
    assert out_bf16.shape == (B, L_new, d_new)
    assert jnp.allclose(out_bf16, ref, atol=6e-2, rtol=6e-2), "bf16 kernel mismatch vs reference"

    print("KERNEL_OK")
</pallas_src>

<mosaic_0001>
module attributes {stable_mosaic.version = 11 : i64} {
  func.func @kernel(%arg0: i32, %arg1: memref<2x8x32xf32, #tpu.memory_space<vmem>>, %arg2: memref<96x32xf32, #tpu.memory_space<vmem>>, %arg3: memref<96x1xf32, #tpu.memory_space<vmem>>, %arg4: memref<32x32xf32, #tpu.memory_space<vmem>>, %arg5: memref<32x1xf32, #tpu.memory_space<vmem>>, %arg6: memref<16x16xf32, #tpu.memory_space<vmem>>, %arg7: memref<2x256xf32, #tpu.memory_space<vmem>>) attributes {dimension_semantics = [#tpu.dimension_semantics<parallel>], iteration_bounds = array<i64: 1>, scalar_prefetch = 0 : i64, scratch_operands = 0 : i64, tpu.core_type = #tpu.core_type<tc>, window_params = [{transform_indices = @transform_0, window_bounds = array<i64: 2, 8, 32>}, {pipeline_mode = #tpu.pipeline_mode<synchronous>, transform_indices = @transform_1, window_bounds = array<i64: 96, 32>}, {pipeline_mode = #tpu.pipeline_mode<synchronous>, transform_indices = @transform_2, window_bounds = array<i64: 96, 1>}, {pipeline_mode = #tpu.pipeline_mode<synchronous>, transform_indices = @transform_3, window_bounds = array<i64: 32, 32>}, {pipeline_mode = #tpu.pipeline_mode<synchronous>, transform_indices = @transform_4, window_bounds = array<i64: 32, 1>}, {pipeline_mode = #tpu.pipeline_mode<synchronous>, transform_indices = @transform_5, window_bounds = array<i64: 16, 16>}, {transform_indices = @transform_6, window_bounds = array<i64: 2, 256>}]} {
    %c0 = arith.constant 0 : index
    %c0_0 = arith.constant 0 : index
    %c0_1 = arith.constant 0 : index
    %0 = vector.load %arg1[%c0, %c0_0, %c0_1] : memref<2x8x32xf32, #tpu.memory_space<vmem>>, vector<2x8x32xf32>
    %1 = vector.shape_cast %0 : vector<2x8x32xf32> to vector<16x32xf32>
    %c0_2 = arith.constant 0 : index
    %c0_3 = arith.constant 0 : index
    %2 = vector.load %arg2[%c0_2, %c0_3] : memref<96x32xf32, #tpu.memory_space<vmem>>, vector<96x32xf32>
    %cst = arith.constant dense<0.000000e+00> : vector<96x16xf32>
    %3 = tpu.matmul %2, %1, %cst {dimension_numbers = #tpu.dot_dimension_numbers<[1], [1], [0], [0], [0, 0, 1, 0], [], []>} : vector<96x32xf32>, vector<16x32xf32>, vector<96x16xf32> -> vector<96x16xf32>
    %c0_4 = arith.constant 0 : index
    %c0_5 = arith.constant 0 : index
    %4 = vector.load %arg3[%c0_4, %c0_5] : memref<96x1xf32, #tpu.memory_space<vmem>>, vector<96x1xf32>
    %5 = vector.broadcast %4 : vector<96x1xf32> to vector<96x16xf32>
    %6 = arith.addf %3, %5 : vector<96x16xf32>
    %c0_6 = arith.constant 0 : index
    %c0_7 = arith.constant 0 : index
    %7 = vector.load %arg6[%c0_6, %c0_7] : memref<16x16xf32, #tpu.memory_space<vmem>>, vector<16x16xf32>
    %8 = vector.extract_strided_slice %6 {offsets = [0, 0], sizes = [8, 16], strides = [1, 1]} : vector<96x16xf32> to vector<8x16xf32>
    %9 = vector.extract_strided_slice %6 {offsets = [32, 0], sizes = [8, 16], strides = [1, 1]} : vector<96x16xf32> to vector<8x16xf32>
    %10 = vector.extract_strided_slice %6 {offsets = [64, 0], sizes = [8, 16], strides = [1, 1]} : vector<96x16xf32> to vector<8x16xf32>
    %11 = tpu.transpose %8, [1, 0] : vector<8x16xf32> -> vector<16x8xf32>
    %cst_8 = arith.constant dense<0.000000e+00> : vector<16x16xf32>
    %12 = tpu.matmul %11, %9, %cst_8 {dimension_numbers = #tpu.dot_dimension_numbers<[1], [0], [0], [1], [0, 0, 1, 1], [], []>} : vector<16x8xf32>, vector<8x16xf32>, vector<16x16xf32> -> vector<16x16xf32>
    %13 = arith.addf %12, %7 : vector<16x16xf32>
    %cst_9 = arith.constant dense<0xFF800000> : vector<16xf32>
    %14 = vector.multi_reduction <maximumf>, %13, %cst_9 [1] : vector<16x16xf32> to vector<16xf32>
    %15 = vector.shape_cast %14 : vector<16xf32> to vector<16x1xf32>
    %16 = vector.broadcast %15 : vector<16x1xf32> to vector<16x16xf32>
    %17 = arith.subf %13, %16 : vector<16x16xf32>
    %18 = math.exp %17 : vector<16x16xf32>
    %cst_10 = arith.constant dense<0.000000e+00> : vector<16xf32>
    %19 = vector.multi_reduction <add>, %18, %cst_10 [1] : vector<16x16xf32> to vector<16xf32>
    %20 = vector.shape_cast %19 : vector<16xf32> to vector<16x1xf32>
    %21 = tpu.reciprocal %20 {approx = true} : vector<16x1xf32> -> vector<16x1xf32>
    %22 = vector.broadcast %21 : vector<16x1xf32> to vector<16x16xf32>
    %23 = arith.mulf %18, %22 : vector<16x16xf32>
    %cst_11 = arith.constant dense<0.000000e+00> : vector<8x16xf32>
    %24 = tpu.matmul %10, %23, %cst_11 {dimension_numbers = #tpu.dot_dimension_numbers<[1], [1], [0], [0], [0, 0, 1, 0], [], []>} : vector<8x16xf32>, vector<16x16xf32>, vector<8x16xf32> -> vector<8x16xf32>
    %25 = vector.extract_strided_slice %6 {offsets = [8, 0], sizes = [8, 16], strides = [1, 1]} : vector<96x16xf32> to vector<8x16xf32>
    %26 = vector.extract_strided_slice %6 {offsets = [40, 0], sizes = [8, 16], strides = [1, 1]} : vector<96x16xf32> to vector<8x16xf32>
    %27 = vector.extract_strided_slice %6 {offsets = [72, 0], sizes = [8, 16], strides = [1, 1]} : vector<96x16xf32> to vector<8x16xf32>
    %28 = tpu.transpose %25, [1, 0] : vector<8x16xf32> -> vector<16x8xf32>
    %cst_12 = arith.constant dense<0.000000e+00> : vector<16x16xf32>
    %29 = tpu.matmul %28, %26, %cst_12 {dimension_numbers = #tpu.dot_dimension_numbers<[1], [0], [0], [1], [0, 0, 1, 1], [], []>} : vector<16x8xf32>, vector<8x16xf32>, vector<16x16xf32> -> vector<16x16xf32>
    %30 = arith.addf %29, %7 : vector<16x16xf32>
    %cst_13 = arith.constant dense<0xFF800000> : vector<16xf32>
    %31 = vector.multi_reduction <maximumf>, %30, %cst_13 [1] : vector<16x16xf32> to vector<16xf32>
    %32 = vector.shape_cast %31 : vector<16xf32> to vector<16x1xf32>
    %33 = vector.broadcast %32 : vector<16x1xf32> to vector<16x16xf32>
    %34 = arith.subf %30, %33 : vector<16x16xf32>
    %35 = math.exp %34 : vector<16x16xf32>
    %cst_14 = arith.constant dense<0.000000e+00> : vector<16xf32>
    %36 = vector.multi_reduction <add>, %35, %cst_14 [1] : vector<16x16xf32> to vector<16xf32>
    %37 = vector.shape_cast %36 : vector<16xf32> to vector<16x1xf32>
    %38 = tpu.reciprocal %37 {approx = true} : vector<16x1xf32> -> vector<16x1xf32>
    %39 = vector.broadcast %38 : vector<16x1xf32> to vector<16x16xf32>
    %40 = arith.mulf %35, %39 : vector<16x16xf32>
    %cst_15 = arith.constant dense<0.000000e+00> : vector<8x16xf32>
    %41 = tpu.matmul %27, %40, %cst_15 {dimension_numbers = #tpu.dot_dimension_numbers<[1], [1], [0], [0], [0, 0, 1, 0], [], []>} : vector<8x16xf32>, vector<16x16xf32>, vector<8x16xf32> -> vector<8x16xf32>
    %42 = vector.extract_strided_slice %6 {offsets = [16, 0], sizes = [8, 16], strides = [1, 1]} : vector<96x16xf32> to vector<8x16xf32>
    %43 = vector.extract_strided_slice %6 {offsets = [48, 0], sizes = [8, 16], strides = [1, 1]} : vector<96x16xf32> to vector<8x16xf32>
    %44 = vector.extract_strided_slice %6 {offsets = [80, 0], sizes = [8, 16], strides = [1, 1]} : vector<96x16xf32> to vector<8x16xf32>
    %45 = tpu.transpose %42, [1, 0] : vector<8x16xf32> -> vector<16x8xf32>
    %cst_16 = arith.constant dense<0.000000e+00> : vector<16x16xf32>
    %46 = tpu.matmul %45, %43, %cst_16 {dimension_numbers = #tpu.dot_dimension_numbers<[1], [0], [0], [1], [0, 0, 1, 1], [], []>} : vector<16x8xf32>, vector<8x16xf32>, vector<16x16xf32> -> vector<16x16xf32>
    %47 = arith.addf %46, %7 : vector<16x16xf32>
    %cst_17 = arith.constant dense<0xFF800000> : vector<16xf32>
    %48 = vector.multi_reduction <maximumf>, %47, %cst_17 [1] : vector<16x16xf32> to vector<16xf32>
    %49 = vector.shape_cast %48 : vector<16xf32> to vector<16x1xf32>
    %50 = vector.broadcast %49 : vector<16x1xf32> to vector<16x16xf32>
    %51 = arith.subf %47, %50 : vector<16x16xf32>
    %52 = math.exp %51 : vector<16x16xf32>
    %cst_18 = arith.constant dense<0.000000e+00> : vector<16xf32>
    %53 = vector.multi_reduction <add>, %52, %cst_18 [1] : vector<16x16xf32> to vector<16xf32>
    %54 = vector.shape_cast %53 : vector<16xf32> to vector<16x1xf32>
    %55 = tpu.reciprocal %54 {approx = true} : vector<16x1xf32> -> vector<16x1xf32>
    %56 = vector.broadcast %55 : vector<16x1xf32> to vector<16x16xf32>
    %57 = arith.mulf %52, %56 : vector<16x16xf32>
    %cst_19 = arith.constant dense<0.000000e+00> : vector<8x16xf32>
    %58 = tpu.matmul %44, %57, %cst_19 {dimension_numbers = #tpu.dot_dimension_numbers<[1], [1], [0], [0], [0, 0, 1, 0], [], []>} : vector<8x16xf32>, vector<16x16xf32>, vector<8x16xf32> -> vector<8x16xf32>
    %59 = vector.extract_strided_slice %6 {offsets = [24, 0], sizes = [8, 16], strides = [1, 1]} : vector<96x16xf32> to vector<8x16xf32>
    %60 = vector.extract_strided_slice %6 {offsets = [56, 0], sizes = [8, 16], strides = [1, 1]} : vector<96x16xf32> to vector<8x16xf32>
    %61 = vector.extract_strided_slice %6 {offsets = [88, 0], sizes = [8, 16], strides = [1, 1]} : vector<96x16xf32> to vector<8x16xf32>
    %62 = tpu.transpose %59, [1, 0] : vector<8x16xf32> -> vector<16x8xf32>
    %cst_20 = arith.constant dense<0.000000e+00> : vector<16x16xf32>
    %63 = tpu.matmul %62, %60, %cst_20 {dimension_numbers = #tpu.dot_dimension_numbers<[1], [0], [0], [1], [0, 0, 1, 1], [], []>} : vector<16x8xf32>, vector<8x16xf32>, vector<16x16xf32> -> vector<16x16xf32>
    %64 = arith.addf %63, %7 : vector<16x16xf32>
    %cst_21 = arith.constant dense<0xFF800000> : vector<16xf32>
    %65 = vector.multi_reduction <maximumf>, %64, %cst_21 [1] : vector<16x16xf32> to vector<16xf32>
    %66 = vector.shape_cast %65 : vector<16xf32> to vector<16x1xf32>
    %67 = vector.broadcast %66 : vector<16x1xf32> to vector<16x16xf32>
    %68 = arith.subf %64, %67 : vector<16x16xf32>
    %69 = math.exp %68 : vector<16x16xf32>
    %cst_22 = arith.constant dense<0.000000e+00> : vector<16xf32>
    %70 = vector.multi_reduction <add>, %69, %cst_22 [1] : vector<16x16xf32> to vector<16xf32>
    %71 = vector.shape_cast %70 : vector<16xf32> to vector<16x1xf32>
    %72 = tpu.reciprocal %71 {approx = true} : vector<16x1xf32> -> vector<16x1xf32>
    %73 = vector.broadcast %72 : vector<16x1xf32> to vector<16x16xf32>
    %74 = arith.mulf %69, %73 : vector<16x16xf32>
    %cst_23 = arith.constant dense<0.000000e+00> : vector<8x16xf32>
    %75 = tpu.matmul %61, %74, %cst_23 {dimension_numbers = #tpu.dot_dimension_numbers<[1], [1], [0], [0], [0, 0, 1, 0], [], []>} : vector<8x16xf32>, vector<16x16xf32>, vector<8x16xf32> -> vector<8x16xf32>
    %76 = tpu.concatenate %24, %41, %58, %75 in 0 : vector<8x16xf32>, vector<8x16xf32>, vector<8x16xf32>, vector<8x16xf32> -> vector<32x16xf32>
    %c0_24 = arith.constant 0 : index
    %c0_25 = arith.constant 0 : index
    %77 = vector.load %arg4[%c0_24, %c0_25] : memref<32x32xf32, #tpu.memory_space<vmem>>, vector<32x32xf32>
    %cst_26 = arith.constant dense<0.000000e+00> : vector<32x16xf32>
    %78 = tpu.matmul %77, %76, %cst_26 {dimension_numbers = #tpu.dot_dimension_numbers<[1], [0], [0], [1], [0, 0, 1, 1], [], []>} : vector<32x32xf32>, vector<32x16xf32>, vector<32x16xf32> -> vector<32x16xf32>
    %c0_27 = arith.constant 0 : index
    %c0_28 = arith.constant 0 : index
    %79 = vector.load %arg5[%c0_27, %c0_28] : memref<32x1xf32, #tpu.memory_space<vmem>>, vector<32x1xf32>
    %80 = vector.broadcast %79 : vector<32x1xf32> to vector<32x16xf32>
    %81 = arith.addf %78, %80 : vector<32x16xf32>
    %82 = tpu.transpose %81, [1, 0] : vector<32x16xf32> -> vector<16x32xf32>
    %83 = vector.shape_cast %82 : vector<16x32xf32> to vector<2x256xf32>
    %c0_29 = arith.constant 0 : index
    %c0_30 = arith.constant 0 : index
    %84 = vector.load %arg7[%c0_29, %c0_30] : memref<2x256xf32, #tpu.memory_space<vmem>>, vector<2x256xf32>
    tpu.vector_store %arg7[%c0_29, %c0_30], %83 {strides = array<i32>} : memref<2x256xf32, #tpu.memory_space<vmem>>, vector<2x256xf32>,
    return
  }
  func.func @transform_0(%arg0: i32) -> (i32, i32, i32) {
    %c0_i32 = arith.constant 0 : i32
    %c0_i32_0 = arith.constant 0 : i32
    %c0_i32_1 = arith.constant 0 : i32
    return %arg0, %c0_i32, %c0_i32_0 : i32, i32, i32
  }
  func.func @transform_1(%arg0: i32) -> (i32, i32) {
    %c0_i32 = arith.constant 0 : i32
    %c0_i32_0 = arith.constant 0 : i32
    %c0_i32_1 = arith.constant 0 : i32
    return %c0_i32, %c0_i32_0 : i32, i32
  }
  func.func @transform_2(%arg0: i32) -> (i32, i32) {
    %c0_i32 = arith.constant 0 : i32
    %c0_i32_0 = arith.constant 0 : i32
    %c0_i32_1 = arith.constant 0 : i32
    return %c0_i32, %c0_i32_0 : i32, i32
  }
  func.func @transform_3(%arg0: i32) -> (i32, i32) {
    %c0_i32 = arith.constant 0 : i32
    %c0_i32_0 = arith.constant 0 : i32
    %c0_i32_1 = arith.constant 0 : i32
    return %c0_i32, %c0_i32_0 : i32, i32
  }
  func.func @transform_4(%arg0: i32) -> (i32, i32) {
    %c0_i32 = arith.constant 0 : i32
    %c0_i32_0 = arith.constant 0 : i32
    %c0_i32_1 = arith.constant 0 : i32
    return %c0_i32, %c0_i32_0 : i32, i32
  }
  func.func @transform_5(%arg0: i32) -> (i32, i32) {
    %c0_i32 = arith.constant 0 : i32
    %c0_i32_0 = arith.constant 0 : i32
    %c0_i32_1 = arith.constant 0 : i32
    return %c0_i32, %c0_i32_0 : i32, i32
  }
  func.func @transform_6(%arg0: i32) -> (i32, i32) {
    %c0_i32 = arith.constant 0 : i32
    %c0_i32_0 = arith.constant 0 : i32
    return %arg0, %c0_i32 : i32, i32
  }
}

module attributes {stable_mosaic.version = 11 : i64} {
  func.func @kernel(%arg0: i32, %arg1: memref<2x8x32xf32, #tpu.memory_space<vmem>>, %arg2: memref<96x32xf32, #tpu.memory_space<vmem>>, %arg3: memref<96x1xf32, #tpu.memory_space<vmem>>, %arg4: memref<32x32xf32, #tpu.memory_space<vmem>>, %arg5: memref<32x1xf32, #tpu.memory_space<vmem>>, %arg6: memref<16x16xf32, #tpu.memory_space<vmem>>, %arg7: memref<2x8x32xf32, #tpu.memory_space<vmem>>) attributes {dimension_semantics = [#tpu.dimension_semantics<parallel>], iteration_bounds = array<i64: 1>, scalar_prefetch = 0 : i64, scratch_operands = 0 : i64, tpu.core_type = #tpu.core_type<tc>, window_params = [{transform_indices = @transform_0, window_bounds = array<i64: 2, 8, 32>}, {pipeline_mode = #tpu.pipeline_mode<synchronous>, transform_indices = @transform_1, window_bounds = array<i64: 96, 32>}, {pipeline_mode = #tpu.pipeline_mode<synchronous>, transform_indices = @transform_2, window_bounds = array<i64: 96, 1>}, {pipeline_mode = #tpu.pipeline_mode<synchronous>, transform_indices = @transform_3, window_bounds = array<i64: 32, 32>}, {pipeline_mode = #tpu.pipeline_mode<synchronous>, transform_indices = @transform_4, window_bounds = array<i64: 32, 1>}, {pipeline_mode = #tpu.pipeline_mode<synchronous>, transform_indices = @transform_5, window_bounds = array<i64: 16, 16>}, {transform_indices = @transform_6, window_bounds = array<i64: 2, 8, 32>}]} {
    %c0 = arith.constant 0 : index
    %c0_0 = arith.constant 0 : index
    %c0_1 = arith.constant 0 : index
    %0 = vector.load %arg1[%c0, %c0_0, %c0_1] : memref<2x8x32xf32, #tpu.memory_space<vmem>>, vector<2x8x32xf32>
    %1 = vector.shape_cast %0 : vector<2x8x32xf32> to vector<16x32xf32>
    %c0_2 = arith.constant 0 : index
    %c0_3 = arith.constant 0 : index
    %2 = vector.load %arg2[%c0_2, %c0_3] : memref<96x32xf32, #tpu.memory_space<vmem>>, vector<96x32xf32>
    %cst = arith.constant dense<0.000000e+00> : vector<96x16xf32>
    %3 = tpu.matmul %2, %1, %cst {dimension_numbers = #tpu.dot_dimension_numbers<[1], [1], [0], [0], [0, 0, 1, 0], [], []>} : vector<96x32xf32>, vector<16x32xf32>, vector<96x16xf32> -> vector<96x16xf32>
    %c0_4 = arith.constant 0 : index
    %c0_5 = arith.constant 0 : index
    %4 = vector.load %arg3[%c0_4, %c0_5] : memref<96x1xf32, #tpu.memory_space<vmem>>, vector<96x1xf32>
    %5 = vector.broadcast %4 : vector<96x1xf32> to vector<96x16xf32>
    %6 = arith.addf %3, %5 : vector<96x16xf32>
    %c0_6 = arith.constant 0 : index
    %c0_7 = arith.constant 0 : index
    %7 = vector.load %arg6[%c0_6, %c0_7] : memref<16x16xf32, #tpu.memory_space<vmem>>, vector<16x16xf32>
    %8 = vector.extract_strided_slice %6 {offsets = [0, 0], sizes = [8, 16], strides = [1, 1]} : vector<96x16xf32> to vector<8x16xf32>
    %9 = vector.extract_strided_slice %6 {offsets = [32, 0], sizes = [8, 16], strides = [1, 1]} : vector<96x16xf32> to vector<8x16xf32>
    %10 = vector.extract_strided_slice %6 {offsets = [64, 0], sizes = [8, 16], strides = [1, 1]} : vector<96x16xf32> to vector<8x16xf32>
    %11 = tpu.transpose %8, [1, 0] : vector<8x16xf32> -> vector<16x8xf32>
    %cst_8 = arith.constant dense<0.000000e+00> : vector<16x16xf32>
    %12 = tpu.matmul %11, %9, %cst_8 {dimension_numbers = #tpu.dot_dimension_numbers<[1], [0], [0], [1], [0, 0, 1, 1], [], []>} : vector<16x8xf32>, vector<8x16xf32>, vector<16x16xf32> -> vector<16x16xf32>
    %13 = arith.addf %12, %7 : vector<16x16xf32>
    %cst_9 = arith.constant dense<0xFF800000> : vector<16xf32>
    %14 = vector.multi_reduction <maximumf>, %13, %cst_9 [1] : vector<16x16xf32> to vector<16xf32>
    %15 = vector.shape_cast %14 : vector<16xf32> to vector<16x1xf32>
    %16 = vector.broadcast %15 : vector<16x1xf32> to vector<16x16xf32>
    %17 = arith.subf %13, %16 : vector<16x16xf32>
    %18 = math.exp %17 : vector<16x16xf32>
    %cst_10 = arith.constant dense<0.000000e+00> : vector<16xf32>
    %19 = vector.multi_reduction <add>, %18, %cst_10 [1] : vector<16x16xf32> to vector<16xf32>
    %20 = vector.shape_cast %19 : vector<16xf32> to vector<16x1xf32>
    %21 = tpu.reciprocal %20 {approx = true} : vector<16x1xf32> -> vector<16x1xf32>
    %22 = vector.broadcast %21 : vector<16x1xf32> to vector<16x16xf32>
    %23 = arith.mulf %18, %22 : vector<16x16xf32>
    %cst_11 = arith.constant dense<0.000000e+00> : vector<8x16xf32>
    %24 = tpu.matmul %10, %23, %cst_11 {dimension_numbers = #tpu.dot_dimension_numbers<[1], [1], [0], [0], [0, 0, 1, 0], [], []>} : vector<8x16xf32>, vector<16x16xf32>, vector<8x16xf32> -> vector<8x16xf32>
    %25 = vector.extract_strided_slice %6 {offsets = [8, 0], sizes = [8, 16], strides = [1, 1]} : vector<96x16xf32> to vector<8x16xf32>
    %26 = vector.extract_strided_slice %6 {offsets = [40, 0], sizes = [8, 16], strides = [1, 1]} : vector<96x16xf32> to vector<8x16xf32>
    %27 = vector.extract_strided_slice %6 {offsets = [72, 0], sizes = [8, 16], strides = [1, 1]} : vector<96x16xf32> to vector<8x16xf32>
    %28 = tpu.transpose %25, [1, 0] : vector<8x16xf32> -> vector<16x8xf32>
    %cst_12 = arith.constant dense<0.000000e+00> : vector<16x16xf32>
    %29 = tpu.matmul %28, %26, %cst_12 {dimension_numbers = #tpu.dot_dimension_numbers<[1], [0], [0], [1], [0, 0, 1, 1], [], []>} : vector<16x8xf32>, vector<8x16xf32>, vector<16x16xf32> -> vector<16x16xf32>
    %30 = arith.addf %29, %7 : vector<16x16xf32>
    %cst_13 = arith.constant dense<0xFF800000> : vector<16xf32>
    %31 = vector.multi_reduction <maximumf>, %30, %cst_13 [1] : vector<16x16xf32> to vector<16xf32>
    %32 = vector.shape_cast %31 : vector<16xf32> to vector<16x1xf32>
    %33 = vector.broadcast %32 : vector<16x1xf32> to vector<16x16xf32>
    %34 = arith.subf %30, %33 : vector<16x16xf32>
    %35 = math.exp %34 : vector<16x16xf32>
    %cst_14 = arith.constant dense<0.000000e+00> : vector<16xf32>
    %36 = vector.multi_reduction <add>, %35, %cst_14 [1] : vector<16x16xf32> to vector<16xf32>
    %37 = vector.shape_cast %36 : vector<16xf32> to vector<16x1xf32>
    %38 = tpu.reciprocal %37 {approx = true} : vector<16x1xf32> -> vector<16x1xf32>
    %39 = vector.broadcast %38 : vector<16x1xf32> to vector<16x16xf32>
    %40 = arith.mulf %35, %39 : vector<16x16xf32>
    %cst_15 = arith.constant dense<0.000000e+00> : vector<8x16xf32>
    %41 = tpu.matmul %27, %40, %cst_15 {dimension_numbers = #tpu.dot_dimension_numbers<[1], [1], [0], [0], [0, 0, 1, 0], [], []>} : vector<8x16xf32>, vector<16x16xf32>, vector<8x16xf32> -> vector<8x16xf32>
    %42 = vector.extract_strided_slice %6 {offsets = [16, 0], sizes = [8, 16], strides = [1, 1]} : vector<96x16xf32> to vector<8x16xf32>
    %43 = vector.extract_strided_slice %6 {offsets = [48, 0], sizes = [8, 16], strides = [1, 1]} : vector<96x16xf32> to vector<8x16xf32>
    %44 = vector.extract_strided_slice %6 {offsets = [80, 0], sizes = [8, 16], strides = [1, 1]} : vector<96x16xf32> to vector<8x16xf32>
    %45 = tpu.transpose %42, [1, 0] : vector<8x16xf32> -> vector<16x8xf32>
    %cst_16 = arith.constant dense<0.000000e+00> : vector<16x16xf32>
    %46 = tpu.matmul %45, %43, %cst_16 {dimension_numbers = #tpu.dot_dimension_numbers<[1], [0], [0], [1], [0, 0, 1, 1], [], []>} : vector<16x8xf32>, vector<8x16xf32>, vector<16x16xf32> -> vector<16x16xf32>
    %47 = arith.addf %46, %7 : vector<16x16xf32>
    %cst_17 = arith.constant dense<0xFF800000> : vector<16xf32>
    %48 = vector.multi_reduction <maximumf>, %47, %cst_17 [1] : vector<16x16xf32> to vector<16xf32>
    %49 = vector.shape_cast %48 : vector<16xf32> to vector<16x1xf32>
    %50 = vector.broadcast %49 : vector<16x1xf32> to vector<16x16xf32>
    %51 = arith.subf %47, %50 : vector<16x16xf32>
    %52 = math.exp %51 : vector<16x16xf32>
    %cst_18 = arith.constant dense<0.000000e+00> : vector<16xf32>
    %53 = vector.multi_reduction <add>, %52, %cst_18 [1] : vector<16x16xf32> to vector<16xf32>
    %54 = vector.shape_cast %53 : vector<16xf32> to vector<16x1xf32>
    %55 = tpu.reciprocal %54 {approx = true} : vector<16x1xf32> -> vector<16x1xf32>
    %56 = vector.broadcast %55 : vector<16x1xf32> to vector<16x16xf32>
    %57 = arith.mulf %52, %56 : vector<16x16xf32>
    %cst_19 = arith.constant dense<0.000000e+00> : vector<8x16xf32>
    %58 = tpu.matmul %44, %57, %cst_19 {dimension_numbers = #tpu.dot_dimension_numbers<[1], [1], [0], [0], [0, 0, 1, 0], [], []>} : vector<8x16xf32>, vector<16x16xf32>, vector<8x16xf32> -> vector<8x16xf32>
    %59 = vector.extract_strided_slice %6 {offsets = [24, 0], sizes = [8, 16], strides = [1, 1]} : vector<96x16xf32> to vector<8x16xf32>
    %60 = vector.extract_strided_slice %6 {offsets = [56, 0], sizes = [8, 16], strides = [1, 1]} : vector<96x16xf32> to vector<8x16xf32>
    %61 = vector.extract_strided_slice %6 {offsets = [88, 0], sizes = [8, 16], strides = [1, 1]} : vector<96x16xf32> to vector<8x16xf32>
    %62 = tpu.transpose %59, [1, 0] : vector<8x16xf32> -> vector<16x8xf32>
    %cst_20 = arith.constant dense<0.000000e+00> : vector<16x16xf32>
    %63 = tpu.matmul %62, %60, %cst_20 {dimension_numbers = #tpu.dot_dimension_numbers<[1], [0], [0], [1], [0, 0, 1, 1], [], []>} : vector<16x8xf32>, vector<8x16xf32>, vector<16x16xf32> -> vector<16x16xf32>
    %64 = arith.addf %63, %7 : vector<16x16xf32>
    %cst_21 = arith.constant dense<0xFF800000> : vector<16xf32>
    %65 = vector.multi_reduction <maximumf>, %64, %cst_21 [1] : vector<16x16xf32> to vector<16xf32>
    %66 = vector.shape_cast %65 : vector<16xf32> to vector<16x1xf32>
    %67 = vector.broadcast %66 : vector<16x1xf32> to vector<16x16xf32>
    %68 = arith.subf %64, %67 : vector<16x16xf32>
    %69 = math.exp %68 : vector<16x16xf32>
    %cst_22 = arith.constant dense<0.000000e+00> : vector<16xf32>
    %70 = vector.multi_reduction <add>, %69, %cst_22 [1] : vector<16x16xf32> to vector<16xf32>
    %71 = vector.shape_cast %70 : vector<16xf32> to vector<16x1xf32>
    %72 = tpu.reciprocal %71 {approx = true} : vector<16x1xf32> -> vector<16x1xf32>
    %73 = vector.broadcast %72 : vector<16x1xf32> to vector<16x16xf32>
    %74 = arith.mulf %69, %73 : vector<16x16xf32>
    %cst_23 = arith.constant dense<0.000000e+00> : vector<8x16xf32>
    %75 = tpu.matmul %61, %74, %cst_23 {dimension_numbers = #tpu.dot_dimension_numbers<[1], [1], [0], [0], [0, 0, 1, 0], [], []>} : vector<8x16xf32>, vector<16x16xf32>, vector<8x16xf32> -> vector<8x16xf32>
    %76 = tpu.concatenate %24, %41, %58, %75 in 0 : vector<8x16xf32>, vector<8x16xf32>, vector<8x16xf32>, vector<8x16xf32> -> vector<32x16xf32>
    %c0_24 = arith.constant 0 : index
    %c0_25 = arith.constant 0 : index
    %77 = vector.load %arg4[%c0_24, %c0_25] : memref<32x32xf32, #tpu.memory_space<vmem>>, vector<32x32xf32>
    %cst_26 = arith.constant dense<0.000000e+00> : vector<32x16xf32>
    %78 = tpu.matmul %77, %76, %cst_26 {dimension_numbers = #tpu.dot_dimension_numbers<[1], [0], [0], [1], [0, 0, 1, 1], [], []>} : vector<32x32xf32>, vector<32x16xf32>, vector<32x16xf32> -> vector<32x16xf32>
    %c0_27 = arith.constant 0 : index
    %c0_28 = arith.constant 0 : index
    %79 = vector.load %arg5[%c0_27, %c0_28] : memref<32x1xf32, #tpu.memory_space<vmem>>, vector<32x1xf32>
    %80 = vector.broadcast %79 : vector<32x1xf32> to vector<32x16xf32>
    %81 = arith.addf %78, %80 : vector<32x16xf32>
    %82 = tpu.transpose %81, [1, 0] : vector<32x16xf32> -> vector<16x32xf32>
    %83 = vector.shape_cast %82 : vector<16x32xf32> to vector<2x8x32xf32>
    %c0_29 = arith.constant 0 : index
    %c0_30 = arith.constant 0 : index
    %c0_31 = arith.constant 0 : index
    %84 = vector.load %arg7[%c0_29, %c0_30, %c0_31] : memref<2x8x32xf32, #tpu.memory_space<vmem>>, vector<2x8x32xf32>
    tpu.vector_store %arg7[%c0_29, %c0_30, %c0_31], %83 {strides = array<i32>} : memref<2x8x32xf32, #tpu.memory_space<vmem>>, vector<2x8x32xf32>,
    return
  }
  func.func @transform_0(%arg0: i32) -> (i32, i32, i32) {
    %c0_i32 = arith.constant 0 : i32
    %c0_i32_0 = arith.constant 0 : i32
    %c0_i32_1 = arith.constant 0 : i32
    return %arg0, %c0_i32, %c0_i32_0 : i32, i32, i32
  }
  func.func @transform_1(%arg0: i32) -> (i32, i32) {
    %c0_i32 = arith.constant 0 : i32
    %c0_i32_0 = arith.constant 0 : i32
    %c0_i32_1 = arith.constant 0 : i32
    return %c0_i32, %c0_i32_0 : i32, i32
  }
  func.func @transform_2(%arg0: i32) -> (i32, i32) {
    %c0_i32 = arith.constant 0 : i32
    %c0_i32_0 = arith.constant 0 : i32
    %c0_i32_1 = arith.constant 0 : i32
    return %c0_i32, %c0_i32_0 : i32, i32
  }
  func.func @transform_3(%arg0: i32) -> (i32, i32) {
    %c0_i32 = arith.constant 0 : i32
    %c0_i32_0 = arith.constant 0 : i32
    %c0_i32_1 = arith.constant 0 : i32
    return %c0_i32, %c0_i32_0 : i32, i32
  }
  func.func @transform_4(%arg0: i32) -> (i32, i32) {
    %c0_i32 = arith.constant 0 : i32
    %c0_i32_0 = arith.constant 0 : i32
    %c0_i32_1 = arith.constant 0 : i32
    return %c0_i32, %c0_i32_0 : i32, i32
  }
  func.func @transform_5(%arg0: i32) -> (i32, i32) {
    %c0_i32 = arith.constant 0 : i32
    %c0_i32_0 = arith.constant 0 : i32
    %c0_i32_1 = arith.constant 0 : i32
    return %c0_i32, %c0_i32_0 : i32, i32
  }
  func.func @transform_6(%arg0: i32) -> (i32, i32, i32) {
    %c0_i32 = arith.constant 0 : i32
    %c0_i32_0 = arith.constant 0 : i32
    %c0_i32_1 = arith.constant 0 : i32
    return %arg0, %c0_i32, %c0_i32_0 : i32, i32, i32
  }
}

</mosaic_0001>

<bundles_post_ra>
// kernel: tpu_custom_call.1
= control target key start
LH: loop header
LB: loop body
LE: loop exit
PB: predicated region body
PF: predicated region fallthrough
CT: control target
= control target key end

     0   :  { %vm110_vm0 = vcmask 261120   ;;  %v1543_v3 = vmov 0   ;;  %s1807_s0 = inlined_call_operand.vmem [shape: f32[2,8,32], index: 0, kind: input, shape index: {}]   ;;  %s1808_s1 = inlined_call_operand.vmem [shape: f32[96,32], index: 1, kind: input, shape index: {}]   ;;  %s1809_s2 = inlined_call_operand.vmem [shape: f32[96,1], index: 2, kind: input, shape index: {}]   ;;  %s1810_s3 = inlined_call_operand.vmem [shape: f32[32,32], index: 3, kind: input, shape index: {}]   ;;  %s1811_s4 = inlined_call_operand.vmem [shape: f32[32,1], index: 4, kind: input, shape index: {}]   ;;  %s1812_s5 = inlined_call_operand.vmem [shape: f32[16,16], index: 5, kind: input, shape index: {}]   ;;  %s1813_s6 = inlined_call_operand.hbm [shape: f32[2,8,32], index: 6, kind: output, shape index: {}]  }
   0x1   :  { %v25_v0 = vld [vmem:[%s1807_s0 + $0x8] sm:$0xff]  ;;  %v24_v1 = vld [vmem:[%s1807_s0] sm:$0xff]  ;;  %1487 = vset.pattern.permute.xlu0 %v1543_v3 }
   0x2   :  { %v26_v2 = vld [vmem:[%s1808_s1] sm:$0xff]  ;;  %1397 = vmatprep.subr.msk.mxu0 %vm110_vm0, %v25_v0 }
   0x3   :  { %1401 = vmatprep.mubr.msk.f32.mxu0 %vm110_vm0, %v26_v2  ;;  %1398 = vmatpush3.xpose.msk.msra.mxu0 %vm110_vm0, %v25_v0  ;;  %v38_v4 = vld [vmem:[%s1809_s2] sm:$0xff] }
   0x4   :  { %1399 = vmatprep.subr.msk.mxu0 %vm110_vm0, %v24_v1  ;;  %52 = vperm.xlu0 %1487, %v38_v4  }
   0x5   :  { %11 = vsyncpa [#allocation3], 0  ;;  %v42_v5 = vld [vmem:[%s1809_s2 + $0x20] sm:$0xff]  ;;  %v27_v6 = vld [vmem:[%s1808_s1 + $0x8] sm:$0xff]  ;;  %vm312_vm1 = vcmask 64512   ;;  %vm394_vm2 = vcmask 130048  }
   0x6   :  { %v28_v7 = vld [vmem:[%s1808_s1 + $0x10] sm:$0xff]  ;;  %v29_v8 = vld [vmem:[%s1808_s1 + $0x18] sm:$0xff]  ;;  %v30_v9 = vld [vmem:[%s1808_s1 + $0x20] sm:$0xff]  ;;  %v1544_v49 = vmov 0.0   ;;  %vm1545_vm3 = vmmov 0  }
   0x7   :  { %1400 = vmatpush3.xpose.msk.msra.mxu0 %vm110_vm0, %v24_v1  ;;  %v31_v10 = vld [vmem:[%s1808_s1 + $0x28] sm:$0xff]  ;;  %v32_v23 = vld [vmem:[%s1808_s1 + $0x30] sm:$0xff]  ;;  %v33_v24 = vld [vmem:[%s1808_s1 + $0x38] sm:$0xff] }
   0x8   :  { %72 = vperm.xlu0 %1487, %v42_v5   ;;  %v34_v25 = vld [vmem:[%s1808_s1 + $0x40] sm:$0xff]  ;;  %v35_v26 = vld [vmem:[%s1808_s1 + $0x48] sm:$0xff]  ;;  %1448 = vmatprep.subr.mxu0 %v1544_v49 }
   0x9   :  { %v1651_v27 = vld [vmem:[%s1812_s5 + $0x8] sm:$0xff]  ;;  %v1656_v29 = vld [vmem:[%s1812_s5] sm:$0xff] }
   0xa   :  { %1402 = vmatmul.mubr.msk.f32.vlgmr.msra.gmra.mxu0 %vm110_vm0, %v27_v6  ;;  %v39_v35 = vld [vmem:[%s1809_s2 + $0x8] sm:$0xff]  ;;  %v46_v50 = vld [vmem:[%s1809_s2 + $0x40] sm:$0xff] }
   0xb   :  { %1404 = vmatprep.mubr.msk.f32.mxu0 %vm110_vm0, %v28_v7  ;;  %v43_v36 = vld [vmem:[%s1809_s2 + $0x28] sm:$0xff] }
   0xe   :  { %1405 = vmatmul.mubr.msk.f32.gmra.mxu0 %vm110_vm0, %v29_v8 }
   0xf   :  { %1407 = vmatprep.mubr.msk.f32.mxu0 %vm110_vm0, %v30_v9 }
  0x12   :  { %1408 = vmatmul.mubr.msk.f32.gmra.mxu0 %vm110_vm0, %v31_v10 }
  0x13   :  { %1410 = vmatprep.mubr.msk.f32.mxu0 %vm110_vm0, %v32_v23 }
  0x16   :  { %1411 = vmatmul.mubr.msk.f32.gmra.mxu0 %vm110_vm0, %v33_v24 }
  0x17   :  { %1413 = vmatprep.mubr.msk.f32.mxu0 %vm110_vm0, %v34_v25 }
  0x1a   :  { %1414 = vmatmul.mubr.msk.f32.gmra.mxu0 %vm110_vm0, %v35_v26 }
  0x7f   :  { %v53_v12 = vpop.permute.xlu0 %52 }
  0x83   :  { %v73_v18 = vpop.permute.xlu0 %72 }
  0xca   :  { %v1403_v11 = vpop.f32.mrf.mxu0 }
  0xcc   :  { %v219_v13 = vpop.f32.mrf.mxu0 }
  0xcd   :  { %v220_v14 = vadd.f32 %v219_v13, %v53_v12  ;;  %v41_v12 = vld [vmem:[%s1809_s2 + $0x18] sm:$0xff]  ;;  %v44_v13 = vld [vmem:[%s1809_s2 + $0x30] sm:$0xff] }
  0xce   :  { %v1624_v15 = vpop.f32.mrf.mxu0 }
  0xcf   :  { %280 = vxpose.xlu1.b32.start.end [1/1] (short) (narrow) %v220_v14, 16  ;;  %v45_v14 = vld [vmem:[%s1809_s2 + $0x38] sm:$0xff] }
  0xd0   :  { %v1626_v16 = vpop.f32.mrf.mxu0 }
  0xd2   :  { %v1628_v17 = vpop.f32.mrf.mxu0 }
  0xd4   :  { %v239_v19 = vpop.f32.mrf.mxu0 }
  0xd5   :  { %v240_v20 = vadd.f32 %v239_v19, %v73_v18 }
  0xd6   :  { %v1677_v53 = vpop.f32.mrf.mxu0 }
  0xd7   :  { %1419 = vmatprep.subr.mxu1 %v240_v20 }
  0xd8   :  { %1420 = vmatpush3.msra.mxu1 %v240_v20  ;;  %v1679_v54 = vpop.f32.mrf.mxu0 }
  0xd9   :  { %1424 = vmatprep.subr.mxu1 %v1544_v49 }
  0xda   :  { %v1681_v56 = vpop.f32.mrf.mxu0 }
  0xdc   :  { %v259_v60 = vpop.f32.mrf.mxu0 }
  0xed   :  { %1488 = vset.pattern.permute.xlu1 %v1543_v3 }
 0x14b   :  { %v296_v21 = vpop.trf.xlu1 }
 0x14c   :  { %1421 = vmatprep.mubr.msk.f32.mxu1 %vm312_vm1, %v296_v21 }
 0x14f   :  { %v297_v22 = vpop.trf.xlu1 }
 0x150   :  { %1422 = vmatmul.mubr.msk.f32.vlgmr.msra.gmra.mxu1 %vm312_vm1, %v297_v22 }
 0x151   :  { %1428 = vmatprep.mubr.msk.f32.mxu1 %vm1545_vm3, %v1544_v49 }
 0x210   :  { %v1423_v28 = vpop.f32.mrf.mxu1 }
 0x211   :  { %v391_v30 = vadd.f32 %v1423_v28, %v1651_v27 }
 0x212   :  { %v385_v31 = vpop.f32.mrf.mxu1 }
 0x213   :  { %v386_v32 = vadd.f32 %v385_v31, %v1656_v29  ;;  %v398_v33 = vsel %vm394_vm2, %v391_v30, -inf  ;;  %v47_v31 = vld [vmem:[%s1809_s2 + $0x48] sm:$0xff] }
 0x214   :  { %399 = vmax.xlane.f32.xlu1 %v398_v33 }
 0x215   :  { %v395_v34 = vsel %vm394_vm2, %v386_v32, -inf }
 0x216   :  { %396 = vmax.xlane.f32.xlu0 %v395_v34 }
 0x22c   :  { %57 = vperm.xlu0 %1487, %v39_v35  }
 0x230   :  { %77 = vperm.xlu0 %1487, %v43_v36  }
 0x29d   :  { %v400_v37 = vpop.xlane.xlu1 %399 }
 0x29e   :  { %v402_v38 = vsub.f32 %v391_v30, %v400_v37 }
 0x29f   :  { %v397_v39 = vpop.xlane.xlu0 %396 }
 0x2a0   :  { %v405_v40 = vmul.f32 1.442695, %v402_v38  ;;  %v401_v41 = vsub.f32 %v386_v32, %v397_v39 }
 0x2a2   :  { %1489 = vpow2.f32 %v405_v40  ;;  %v403_v42 = vmul.f32 1.442695, %v401_v41 }
 0x2a4   :  { %1491 = vpow2.f32 %v403_v42 }
 0x2a7   :  { %v58_v43 = vpop.permute.xlu0 %57 }
 0x2a8   :  { %v225_v44 = vadd.f32 %v1403_v11, %v58_v43  ;;  %v40_v11 = vld [vmem:[%s1809_s2 + $0x10] sm:$0xff] }
 0x2aa   :  { %496 = vxpose.xlu0.b32.start.end [1/1] (short) (narrow) %v225_v44, 16 }
 0x2ab   :  { %v78_v57 = vpop.permute.xlu0 %77 }
 0x2ac   :  { %v245_v0 = vadd.f32 %v1628_v17, %v78_v57 }
 0x2af   :  { %v1490_v45 = vpop.eup %1489 }
 0x2b0   :  { %v410_v46 = vsel %vm394_vm2, %v1490_v45, 0.0 }
 0x2b1   :  { %v1492_v47 = vpop.eup %1491  ;;  %411 = vadd.xlane.f32.xlu1 %v410_v46 }
 0x2b2   :  { %v407_v48 = vsel %vm394_vm2, %v1492_v47, 0.0 }
 0x2b5   :  { %408 = vadd.xlane.f32.xlu1 %v407_v48  ;;  %v36_v48 = vld [vmem:[%s1808_s1 + $0x50] sm:$0xff] }
 0x2b6   :  { %1416 = vmatprep.mubr.msk.f32.mxu0 %vm110_vm0, %v36_v48 }
 0x2c6   :  { %92 = vperm.xlu1 %1488, %v46_v50   ;;  %v37_v50 = vld [vmem:[%s1808_s1 + $0x58] sm:$0xff] }
 0x2c7   :  { %1417 = vmatmul.mubr.msk.f32.gmra.mxu0 %vm110_vm0, %v37_v50 }
 0x2c8   :  { %1452 = vmatprep.mubr.msk.f32.mxu0 %vm1545_vm3, %v1544_v49 }
 0x326   :  { %v512_v63 = vpop.trf.xlu0 }
 0x32a   :  { %v513_v2 = vpop.trf.xlu0 }
 0x33a   :  { %v412_v51 = vpop.xlane.xlu1 %411 }
 0x33b   :  { %1493 = vrcp.f32 %v412_v51 }
 0x33e   :  { %v409_v52 = vpop.xlane.xlu1 %408 }
 0x33f   :  { %1495 = vrcp.f32 %v409_v52 }
 0x342   :  { %v93_v61 = vpop.permute.xlu1 %92 }
 0x343   :  { %v260_v1 = vadd.f32 %v259_v60, %v93_v61 }
 0x348   :  { %v1494_v55 = vpop.eup %1493 }
 0x349   :  { %v416_v58 = vmul.f32 %v1494_v55, %v1490_v45 }
 0x34b   :  { %1425 = vmatpush3.xpose.msk.msra.mxu1 %vm394_vm2, %v416_v58 }
 0x34c   :  { %v1496_v59 = vpop.eup %1495  ;;  %1426 = vmatprep.subr.mxu1 %v1544_v49 }
 0x34d   :  { %v415_v62 = vmul.f32 %v1496_v59, %v1492_v47 }
 0x34f   :  { %1427 = vmatpush3.xpose.msk.msra.mxu1 %vm394_vm2, %v415_v62 }
 0x350   :  { %1431 = vmatprep.subr.mxu1 %v245_v0 }
 0x352   :  { %1429 = vmatmul.mubr.msk.f32.vlgmr.msra.gmra.mxu1 %vm394_vm2, %v260_v1 }
 0x353   :  { %1432 = vmatpush3.msra.mxu1 %v245_v0  ;;  %1433 = vmatprep.mubr.msk.f32.mxu1 %vm312_vm1, %v512_v63 }
 0x354   :  { %1436 = vmatprep.subr.mxu1 %v1544_v49 }
 0x356   :  { %1434 = vmatmul.mubr.msk.f32.vlgmr.msra.gmra.mxu1 %vm312_vm1, %v513_v2 }
 0x357   :  { %1440 = vmatprep.mubr.msk.f32.mxu1 %vm1545_vm3, %v1544_v49 }
 0x412   :  { %v1693_v3 = vpop.f32.mrf.mxu1 }
 0x414   :  { %v1430_v4 = vpop.f32.mrf.mxu1 }
 0x416   :  { %v1435_v5 = vpop.f32.mrf.mxu1 }
 0x417   :  { %v606_v6 = vadd.f32 %v1435_v5, %v1651_v27 }
 0x418   :  { %v600_v7 = vpop.f32.mrf.mxu1 }
 0x419   :  { %v601_v8 = vadd.f32 %v600_v7, %v1656_v29  ;;  %v612_v9 = vsel %vm394_vm2, %v606_v6, -inf }
 0x41a   :  { %613 = vmax.xlane.f32.xlu1 %v612_v9 }
 0x41b   :  { %v609_v10 = vsel %vm394_vm2, %v601_v8, -inf }
 0x41c   :  { %610 = vmax.xlane.f32.xlu0 %v609_v10 }
 0x42b   :  { %62 = vperm.xlu1 %1488, %v40_v11  }
 0x432   :  { %67 = vperm.xlu0 %1487, %v41_v12  }
 0x436   :  { %82 = vperm.xlu0 %1487, %v44_v13  }
 0x43a   :  { %87 = vperm.xlu0 %1487, %v45_v14  }
 0x4a3   :  { %v614_v17 = vpop.xlane.xlu1 %613 }
 0x4a4   :  { %v616_v18 = vsub.f32 %v606_v6, %v614_v17 }
 0x4a5   :  { %v611_v19 = vpop.xlane.xlu0 %610 }
 0x4a6   :  { %v619_v20 = vmul.f32 1.442695, %v616_v18  ;;  %v615_v21 = vsub.f32 %v601_v8, %v611_v19 }
 0x4a7   :  { %v63_v22 = vpop.permute.xlu1 %62 }
 0x4a8   :  { %1497 = vpow2.f32 %v619_v20  ;;  %v617_v23 = vmul.f32 1.442695, %v615_v21  ;;  %v230_v24 = vadd.f32 %v1626_v16, %v63_v22  ;;  %v49_v22 = vld [vmem:[%s1809_s2 + $0x58] sm:$0xff] }
 0x4aa   :  { %1499 = vpow2.f32 %v617_v23  ;;  %710 = vxpose.xlu0.b32.start.end [1/1] (short) (narrow) %v230_v24, 16  ;;  %v1142_v23 = vld [vmem:[%s1811_s4] sm:$0xff]  ;;  %v1143_v24 = vld [vmem:[%s1811_s4 + $0x8] sm:$0xff] }
 0x4ad   :  { %v68_v32 = vpop.permute.xlu0 %67 }
 0x4ae   :  { %v235_v33 = vadd.f32 %v1624_v15, %v68_v32 }
 0x4b1   :  { %v83_v35 = vpop.permute.xlu0 %82 }
 0x4b2   :  { %v250_v43 = vadd.f32 %v1679_v54, %v83_v35  ;;  %v1418_v35 = vpop.f32.mrf.mxu0 }
 0x4b5   :  { %v1498_v25 = vpop.eup %1497  ;;  %v88_v37 = vpop.permute.xlu0 %87 }
 0x4b6   :  { %v624_v26 = vsel %vm394_vm2, %v1498_v25, 0.0  ;;  %v255_v44 = vadd.f32 %v1677_v53, %v88_v37  ;;  %v269_v37 = vpop.f32.mrf.mxu0 }
 0x4b7   :  { %v1500_v28 = vpop.eup %1499  ;;  %625 = vadd.xlane.f32.xlu1 %v624_v26  ;;  %v48_v26 = vld [vmem:[%s1809_s2 + $0x50] sm:$0xff] }
 0x4b8   :  { %v621_v30 = vsel %vm394_vm2, %v1500_v28, 0.0 }
 0x4bb   :  { %622 = vadd.xlane.f32.xlu1 %v621_v30 }
 0x4cc   :  { %97 = vperm.xlu1 %1488, %v47_v31  }
 0x4f5   :  { %924 = vxpose.xlu1.b32.start.end [1/1] (short) (narrow) %v235_v33, 16 }
 0x526   :  { %v726_v42 = vpop.trf.xlu0 }
 0x52a   :  { %v727_v45 = vpop.trf.xlu0 }
 0x540   :  { %v626_v16 = vpop.xlane.xlu1 %625 }
 0x541   :  { %1501 = vrcp.f32 %v626_v16 }
 0x544   :  { %v623_v34 = vpop.xlane.xlu1 %622 }
 0x545   :  { %1503 = vrcp.f32 %v623_v34 }
 0x548   :  { %v98_v40 = vpop.permute.xlu1 %97 }
 0x549   :  { %v265_v15 = vadd.f32 %v1681_v56, %v98_v40 }
 0x54e   :  { %v1502_v36 = vpop.eup %1501 }
 0x54f   :  { %v630_v38 = vmul.f32 %v1502_v36, %v1498_v25  ;;  %v1145_v25 = vld [vmem:[%s1811_s4 + $0x18] sm:$0xff] }
 0x551   :  { %1437 = vmatpush3.xpose.msk.msra.mxu1 %vm394_vm2, %v630_v38 }
 0x552   :  { %v1504_v39 = vpop.eup %1503  ;;  %1438 = vmatprep.subr.mxu1 %v1544_v49 }
 0x553   :  { %v629_v41 = vmul.f32 %v1504_v39, %v1500_v28  ;;  %v1144_v28 = vld [vmem:[%s1811_s4 + $0x10] sm:$0xff] }
 0x555   :  { %1439 = vmatpush3.xpose.msk.msra.mxu1 %vm394_vm2, %v629_v41 }
 0x556   :  { %1443 = vmatprep.subr.mxu1 %v250_v43 }
 0x558   :  { %1441 = vmatmul.mubr.msk.f32.vlgmr.msra.gmra.mxu1 %vm394_vm2, %v265_v15 }
 0x559   :  { %1444 = vmatpush3.msra.mxu1 %v250_v43  ;;  %1445 = vmatprep.mubr.msk.f32.mxu1 %vm312_vm1, %v726_v42 }
 0x55a   :  { %1455 = vmatprep.subr.mxu1 %v255_v44 }
 0x55c   :  { %1446 = vmatmul.mubr.msk.f32.vlgmr.msra.gmra.mxu1 %vm312_vm1, %v727_v45 }
 0x55d   :  { %1456 = vmatpush3.msra.mxu1 %v255_v44 }
 0x55e   :  { %1460 = vmatprep.subr.mxu1 %v1544_v49 }
 0x571   :  { %v940_v46 = vpop.trf.xlu1 }
 0x572   :  { %1457 = vmatprep.mubr.msk.f32.mxu1 %vm312_vm1, %v940_v46  ;;  %v1138_v46 = vld [vmem:[%s1810_s3] sm:$0xff] }
 0x575   :  { %v941_v47 = vpop.trf.xlu1 }
 0x576   :  { %1458 = vmatmul.mubr.msk.f32.vlgmr.msra.gmra.mxu1 %vm312_vm1, %v941_v47 }
 0x577   :  { %1464 = vmatprep.mubr.msk.f32.mxu1 %vm1545_vm3, %v1544_v49 }
 0x618   :  { %v1742_v51 = vpop.f32.mrf.mxu1 }
 0x61a   :  { %v1442_v52 = vpop.f32.mrf.mxu1 }
 0x61c   :  { %v1447_v53 = vpop.f32.mrf.mxu1 }
 0x61d   :  { %v820_v54 = vadd.f32 %v1447_v53, %v1651_v27  ;;  %v1140_v53 = vld [vmem:[%s1810_s3 + $0x10] sm:$0xff] }
 0x61e   :  { %v814_v56 = vpop.f32.mrf.mxu1 }
 0x61f   :  { %v826_v55 = vsel %vm394_vm2, %v820_v54, -inf  ;;  %v815_v62 = vadd.f32 %v814_v56, %v1656_v29 }
 0x620   :  { %827 = vmax.xlane.f32.xlu1 %v826_v55 }
 0x621   :  { %v823_v0 = vsel %vm394_vm2, %v815_v62, -inf }
 0x636   :  { %v1459_v57 = vpop.f32.mrf.mxu1 }
 0x637   :  { %v1034_v58 = vadd.f32 %v1459_v57, %v1651_v27 }
 0x638   :  { %v1028_v59 = vpop.f32.mrf.mxu1 }
 0x639   :  { %v1029_v60 = vadd.f32 %v1028_v59, %v1656_v29  ;;  %v1040_v61 = vsel %vm394_vm2, %v1034_v58, -inf }
 0x63a   :  { %1041 = vmax.xlane.f32.xlu0 %v1040_v61 }
 0x63b   :  { %v1037_v63 = vsel %vm394_vm2, %v1029_v60, -inf }
 0x63e   :  { %1038 = vmax.xlane.f32.xlu0 %v1037_v63 }
 0x642   :  { %824 = vmax.xlane.f32.xlu0 %v823_v0 }
 0x6a9   :  { %v828_v1 = vpop.xlane.xlu1 %827 }
 0x6aa   :  { %v830_v2 = vsub.f32 %v820_v54, %v828_v1 }
 0x6ac   :  { %v833_v4 = vmul.f32 1.442695, %v830_v2 }
 0x6ae   :  { %1505 = vpow2.f32 %v833_v4 }
 0x6bb   :  { %v1506_v5 = vpop.eup %1505 }
 0x6bc   :  { %v838_v27 = vsel %vm394_vm2, %v1506_v5, 0.0 }
 0x6bd   :  { %839 = vadd.xlane.f32.xlu0 %v838_v27 }
 0x6c3   :  { %v1042_v6 = vpop.xlane.xlu0 %1041 }
 0x6c4   :  { %v1044_v9 = vsub.f32 %v1034_v58, %v1042_v6 }
 0x6c6   :  { %v1047_v12 = vmul.f32 1.442695, %v1044_v9 }
 0x6c7   :  { %v1039_v7 = vpop.xlane.xlu0 %1038 }
 0x6c8   :  { %v1043_v8 = vsub.f32 %v1029_v60, %v1039_v7 }
 0x6ca   :  { %v1045_v10 = vmul.f32 1.442695, %v1043_v8 }
 0x6cb   :  { %v825_v29 = vpop.xlane.xlu0 %824 }
 0x6cc   :  { %1507 = vpow2.f32 %v1045_v10  ;;  %v829_v11 = vsub.f32 %v815_v62, %v825_v29 }
 0x6ce   :  { %v831_v13 = vmul.f32 1.442695, %v829_v11 }
 0x6d0   :  { %1509 = vpow2.f32 %v831_v13 }
 0x6d1   :  { %1511 = vpow2.f32 %v1047_v12 }
 0x6d9   :  { %v1508_v14 = vpop.eup %1507 }
 0x6da   :  { %v1049_v17 = vsel %vm394_vm2, %v1508_v14, 0.0 }
 0x6db   :  { %1050 = vadd.xlane.f32.xlu1 %v1049_v17 }
 0x6dd   :  { %v1510_v18 = vpop.eup %1509 }
 0x6de   :  { %v835_v19 = vsel %vm394_vm2, %v1510_v18, 0.0  ;;  %v1512_v20 = vpop.eup %1511 }
 0x6df   :  { %836 = vadd.xlane.f32.xlu0 %v835_v19  ;;  %v1052_v21 = vsel %vm394_vm2, %v1512_v20, 0.0 }
 0x6e3   :  { %1053 = vadd.xlane.f32.xlu0 %v1052_v21 }
 0x6ec   :  { %107 = vperm.xlu1 %1488, %v49_v22  }
 0x6f0   :  { %1148 = vperm.xlu1 %1488, %v1142_v23  }
 0x6f4   :  { %1153 = vperm.xlu1 %1488, %v1143_v24  }
 0x6f8   :  { %1163 = vperm.xlu1 %1488, %v1145_v25  }
 0x6f9   :  { %102 = vperm.xlu0 %1487, %v48_v26  }
 0x6fd   :  { %1158 = vperm.xlu0 %1487, %v1144_v28  }
 0x746   :  { %v840_v30 = vpop.xlane.xlu0 %839 }
 0x747   :  { %1513 = vrcp.f32 %v840_v30 }
 0x754   :  { %v1514_v31 = vpop.eup %1513 }
 0x755   :  { %v844_v32 = vmul.f32 %v1514_v31, %v1506_v5 }
 0x757   :  { %1449 = vmatpush3.xpose.msk.msra.mxu0 %vm394_vm2, %v844_v32 }
 0x758   :  { %1450 = vmatprep.subr.mxu0 %v1544_v49 }
 0x764   :  { %v1051_v16 = vpop.xlane.xlu1 %1050 }
 0x768   :  { %v837_v33 = vpop.xlane.xlu0 %836  ;;  %v108_v15 = vpop.permute.xlu1 %107 }
 0x769   :  { %1515 = vrcp.f32 %v837_v33  ;;  %v275_v45 = vadd.f32 %v1418_v35, %v108_v15 }
 0x76c   :  { %v1054_v34 = vpop.xlane.xlu0 %1053  ;;  %v1149_v54 = vpop.permute.xlu1 %1148 }
 0x76d   :  { %1517 = vrcp.f32 %v1054_v34 }
 0x76e   :  { %1519 = vrcp.f32 %v1051_v16 }
 0x770   :  { %v1154_v59 = vpop.permute.xlu1 %1153 }
 0x774   :  { %v103_v38 = vpop.permute.xlu0 %102  ;;  %v1164_v63 = vpop.permute.xlu1 %1163 }
 0x775   :  { %v270_v41 = vadd.f32 %v269_v37, %v103_v38 }
 0x776   :  { %v1516_v36 = vpop.eup %1515 }
 0x777   :  { %v843_v39 = vmul.f32 %v1516_v36, %v1510_v18 }
 0x779   :  { %1451 = vmatpush3.xpose.msk.msra.mxu0 %vm394_vm2, %v843_v39 }
 0x77a   :  { %v1518_v40 = vpop.eup %1517 }
 0x77b   :  { %v1058_v42 = vmul.f32 %v1518_v40, %v1512_v20  ;;  %v1520_v43 = vpop.eup %1519 }
 0x77c   :  { %1453 = vmatmul.mubr.msk.f32.vlgmr.msra.gmra.mxu0 %vm394_vm2, %v270_v41  ;;  %v1057_v44 = vmul.f32 %v1520_v43, %v1508_v14 }
 0x77d   :  { %1461 = vmatpush3.xpose.msk.msra.mxu1 %vm394_vm2, %v1058_v42  ;;  %1475 = vmatprep.mubr.msk.f32.mxu0 %vm110_vm0, %v1138_v46 }
 0x77e   :  { %1462 = vmatprep.subr.mxu1 %v1544_v49  ;;  %v1139_v49 = vld [vmem:[%s1810_s3 + $0x8] sm:$0xff] }
 0x781   :  { %1463 = vmatpush3.xpose.msk.msra.mxu1 %vm394_vm2, %v1057_v44 }
 0x784   :  { %1465 = vmatmul.mubr.msk.f32.vlgmr.msra.gmra.mxu1 %vm394_vm2, %v275_v45 }
 0x83c   :  { %v920_v47 = vpop.f32.mrf.mxu0 }
 0x83e   :  { %v1454_v48 = vpop.f32.mrf.mxu0 }
 0x844   :  { %v1134_v50 = vpop.f32.mrf.mxu1 }
 0x845   :  { %1467 = vmatprep.subr.mxu0 %v1134_v50 }
 0x846   :  { %v1466_v52 = vpop.f32.mrf.mxu1  ;;  %1468 = vmatpush3.msra.mxu0 %v1134_v50 }
 0x847   :  { %1469 = vmatprep.subr.mxu0 %v920_v47 }
 0x848   :  { %1470 = vmatpush3.msra.mxu0 %v920_v47 }
 0x849   :  { %1471 = vmatprep.subr.mxu0 %v1742_v51 }
 0x84a   :  { %1472 = vmatpush3.msra.mxu0 %v1742_v51  ;;  %v1141_v51 = vld [vmem:[%s1810_s3 + $0x18] sm:$0xff]  ;;  %s1546_s3 = smov [#allocation2]  }
 0x84b   :  { %1473 = vmatprep.subr.mxu0 %v1693_v3  ;;  %s1302_s13 = sshll.u32 %s1546_s3, 4  ;;  %s1303_s13 = int_to_ptr.vmem [resolvable:$true] %s1302_s13 }
 0x84c   :  { %1474 = vmatpush3.msra.mxu0 %v1693_v3  ;;  %v1159_v3 = vpop.permute.xlu0 %1158  ;;  %s1521_s14 = scalar_lea.vmem %s1303_s13, 256  ;;  %p1526_p1 = scmp.lt.s32.totalorder %s1303_s13, %s1303_s13 }
 0x84d   :  { %1476 = vmatmul.mubr.msk.f32.vlgmr.msra.gmra.mxu0 %vm110_vm0, %v1139_v49  ;;  %p1522_p0 = scmp.ne.s32.totalorder %s1303_s13, %s1521_s14  ;;  %p1527_p2 = scmp.lt.s32.totalorder %s1521_s14, %s1521_s14 }
 0x84e   :  { %1478 = vmatprep.mubr.msk.f32.mxu0 %vm110_vm0, %v1140_v53 }
 0x84f   :  { %p1528_p3 = por %p1527_p2, %p1526_p1 }
 0x851   :  { %1479 = vmatmul.mubr.msk.f32.gmra.mxu0 %vm110_vm0, %v1141_v51  ;;  %p1529_p4 = pnand %p1528_p3, %p1522_p0 }
 0x90d   :  { %v1477_v55 = vpop.f32.mrf.mxu0 }
 0x90e   :  { %v1250_v60 = vadd.f32 %v1477_v55, %v1154_v59 }
 0x90f   :  { %v1244_v56 = vpop.f32.mrf.mxu0 }
 0x910   :  { %v1245_v57 = vadd.f32 %v1244_v56, %v1149_v54 }
 0x911   :  { %v1480_v58 = vpop.f32.mrf.mxu0 }
 0x912   :  { %1263 = vxpose.xlu0.b32.start [1/4] (short) (narrow) %v1245_v57, 16  ;;  %v1260_v0 = vadd.f32 %v1480_v58, %v1164_v63 }
 0x913   :  { %v1254_v61 = vpop.f32.mrf.mxu0 }
 0x914   :  { %v1255_v62 = vadd.f32 %v1254_v61, %v1159_v3 }
 0x916   :  { %1264 = vxpose.xlu0.b32.cont [2/4] (short) (narrow) %v1250_v60, 16 }
 0x91a   :  { %1265 = vxpose.xlu0.b32.cont [3/4] (short) (narrow) %v1255_v62, 16 }
 0x91e   :  { %1266 = vxpose.xlu0.b32.end [4/4] (short) (narrow) %v1260_v0, 16 }
 0x98e   :  { %v1279_v1 = vpop.trf.xlu0 }
 0x98f   :  { %1295 = vst.msk [vmem:[#allocation2] sm:$0xff] %vm110_vm0, %v1279_v1 }
 0x992   :  { %v1280_v2 = vpop.trf.xlu0 }
 0x993   :  { %1296 = vst.msk [vmem:[#allocation2 + $0x8] sm:$0xff] %vm110_vm0, %v1280_v2 }
 0x994   :  { %1532 = shalt.err (!%p1529_p4)
}
 0x995   :  { %s1547_s15 = smov 128   ;;  %s1548_s16 = smov 8  }
 0x996   :  { %1308 = dma.vmem_to_hbm [thread:$0]  %s1303_s13, 256, %s1813_s6, [#allocation3], %s1547_s15, %s1547_s15, %s1548_s16  }
 0x997   :  { %1541 = dma.done.wait [#allocation3], 256  }
 0x998   :  { %1542 = vsyncadd [#allocation3], 4294967040 }
 0x999   :  { %1312 = vsyncpa [#allocation3], 1 }

</bundles_post_ra>
